<compile_context>
chip_gen: v7x
topology: tpu7x:2x2x1
jax: 0.10.0
libtpu: 0.0.40
codegen_flags: <defaults>
</compile_context>

<pallas_src>
import jax
import jax.numpy as jnp
from jax.experimental import pallas as pl
from jax.experimental.pallas import tpu as pltpu


# --------------------------------------------------------------------------
# Chip-aware sizing helpers
# --------------------------------------------------------------------------

def _vmem_capacity_bytes():
    """Physical VMEM of the current chip (128 MiB v5e/v6e, 64 MiB v7x)."""
    try:
        return int(pltpu.get_tpu_info().vmem_capacity_bytes)
    except Exception:
        return 64 << 20          # conservative default (v7x)


def _choose_c_tile(C, row_bytes, budget):
    """Largest channel tile whose block (~tc * row_bytes) fits `budget`.

    Returns C if the full-channel block fits, otherwise the largest multiple
    of 8 that fits (preferring a divisor of C so no channel padding is
    needed), or None if even the minimum aligned tile (8) does not fit.
    """
    if C * row_bytes <= budget:
        return C
    tc_max = int(budget // row_bytes) // 8 * 8
    if tc_max < 8:
        return None
    tc_max = min(tc_max, (C // 8) * 8)
    if tc_max < 8:
        return None
    for cand in range(tc_max, 7, -8):      # prefer an exact divisor of C
        if C % cand == 0:
            return cand
    return tc_max                          # caller pads C up to a multiple


def _maybe_pad_c(feat, Cp):
    C = feat.shape[1]
    if Cp == C:
        return feat
    return jnp.pad(feat, ((0, 0), (0, Cp - C), (0, 0)))


# --------------------------------------------------------------------------
# Fused single-pass kernel (primary path)
# --------------------------------------------------------------------------

def _fused_kernel(perm_ref, lam_ref, x_ref, o_ref, mu_sc, sg_sc, scl_sc, bias_sc):
    # perm_ref : (B,) int32 in SMEM       lam_ref : (B,) f32 in SMEM
    # x_ref/o_ref : (B, tc, L) block of the input / output (native dtype)
    # *_sc     : (B, tc, 1) f32 VMEM scratch (stats / folded scale & bias)
    B = x_ref.shape[0]
    L = x_ref.shape[-1]
    inv_l = 1.0 / L
    inv_lm1 = 1.0 / max(L - 1, 1)            # torch.std() is unbiased (ddof=1)

    # ---- per-(b, c) stats over the full spatial extent (f32 accumulation) --
    x32 = x_ref[...].astype(jnp.float32)
    mu = jnp.sum(x32, axis=-1, keepdims=True) * inv_l
    d = x32 - mu                              # centered form: no cancellation
    var = jnp.sum(d * d, axis=-1, keepdims=True) * inv_lm1
    mu_sc[...] = mu
    sg_sc[...] = jnp.sqrt(var) + 1e-6         # matches spec: std(...) + eps

    # ---- cross-batch gather of the permuted partner's stats + lam mixing ---
    # B is static and small; unrolled loop of tiny (tc, 1) column ops.
    for b in range(B):
        p = perm_ref[b]
        lam_b = lam_ref[b]
        mu_b = mu_sc[b]
        sg_b = sg_sc[b]
        mu_p = mu_sc[p]                       # dynamic leading-axis index
        sg_p = sg_sc[p]
        sg_mix = lam_b * sg_b + (1.0 - lam_b) * sg_p
        mu_mix = lam_b * mu_b + (1.0 - lam_b) * mu_p
        scale = sg_mix / sg_b
        scl_sc[b] = scale
        bias_sc[b] = mu_mix - mu_b * scale

    # ---- apply: o = x * scale + bias (FMA in the input dtype; bf16 on
    # v6e/v7x halves vector traffic, f32 inputs stay f32) --------------------
    dt = x_ref.dtype
    o_ref[...] = (x_ref[...] * scl_sc[...].astype(dt)
                  + bias_sc[...].astype(dt)).astype(o_ref.dtype)


def _mixstyle_fused(feat, perm, lam, tc, vmem_limit):
    B, Cp, L = feat.shape
    nc = Cp // tc
    itemsize = feat.dtype.itemsize
    return pl.pallas_call(
        _fused_kernel,
        out_shape=jax.ShapeDtypeStruct((B, Cp, L), feat.dtype),
        grid_spec=pltpu.PrefetchScalarGridSpec(
            num_scalar_prefetch=0,
            grid=(nc,),
            in_specs=[
                pl.BlockSpec(memory_space=pltpu.MemorySpace.SMEM),   # perm
                pl.BlockSpec(memory_space=pltpu.MemorySpace.SMEM),   # lam
                pl.BlockSpec((B, tc, L), lambda c: (0, c, 0)),       # x block
            ],
            out_specs=pl.BlockSpec((B, tc, L), lambda c: (0, c, 0)),
            scratch_shapes=[pltpu.VMEM((B, tc, 1), jnp.float32)] * 4,
        ),
        compiler_params=pltpu.CompilerParams(
            dimension_semantics=("parallel",),
            vmem_limit_bytes=vmem_limit),
        cost_estimate=pl.CostEstimate(
            flops=int(6 * B * Cp * L),
            transcendentals=int(B * Cp),
            bytes_accessed=int(2 * B * Cp * L * itemsize)),
    )(perm, lam, feat)


# --------------------------------------------------------------------------
# Two-pass fallback (huge B * L: full-batch channel tile does not fit VMEM)
# --------------------------------------------------------------------------

def _stats_kernel(x_ref, mu_ref, sigma_ref):
    x = x_ref[...].astype(jnp.float32)        # (1, tc, L)
    L = x.shape[-1]
    inv_l = 1.0 / L
    inv_lm1 = 1.0 / max(L - 1, 1)
    mu = jnp.sum(x, axis=-1, keepdims=True) * inv_l
    d = x - mu
    var = jnp.sum(d * d, axis=-1, keepdims=True) * inv_lm1
    mu_ref[...] = mu
    sigma_ref[...] = jnp.sqrt(var) + 1e-6


def _apply_kernel(perm_ref, lam_ref, x_ref, mu_ref, sg_ref, mu2_ref, sg2_ref,
                  o_ref):
    # perm_ref : (B,) int32 scalar-prefetch (consumed by the index_maps)
    # lam_ref  : (B,) f32 in SMEM
    # x_ref    : (1, tc, L) block, mu/sg own stats, mu2/sg2 partner's stats.
    del perm_ref                               # only used inside the index_maps
    b = pl.program_id(0)
    lam = lam_ref[b]

    mu = mu_ref[...]
    sg = sg_ref[...]
    sigma_mix = lam * sg + (1.0 - lam) * sg2_ref[...]
    mu_mix = lam * mu + (1.0 - lam) * mu2_ref[...]
    scale = sigma_mix / sg
    bias = mu_mix - mu * scale

    dt = x_ref.dtype
    o_ref[...] = (x_ref[...] * scale.astype(dt) + bias.astype(dt)).astype(
        o_ref.dtype)


def _mixstyle_two_pass(feat, perm, lam, tc1, tc2, vmem_limit):
    B, Cp, L = feat.shape
    nc1, nc2 = Cp // tc1, Cp // tc2
    itemsize = feat.dtype.itemsize
    parallel2 = pltpu.CompilerParams(
        dimension_semantics=("parallel", "parallel"),
        vmem_limit_bytes=vmem_limit)

    # ---- Pass 1: per-(B, C) mu / unbiased std, reduced over L. ------------
    mu, sigma = pl.pallas_call(
        _stats_kernel,
        out_shape=(jax.ShapeDtypeStruct((B, Cp, 1), jnp.float32),
                   jax.ShapeDtypeStruct((B, Cp, 1), jnp.float32)),
        grid_spec=pltpu.PrefetchScalarGridSpec(
            num_scalar_prefetch=0,
            grid=(B, nc1),
            in_specs=[pl.BlockSpec((1, tc1, L), lambda b, c: (b, c, 0))],
            out_specs=[pl.BlockSpec((1, tc1, 1), lambda b, c: (b, c, 0)),
                       pl.BlockSpec((1, tc1, 1), lambda b, c: (b, c, 0))],
        ),
        compiler_params=parallel2,
        cost_estimate=pl.CostEstimate(
            flops=int(3 * B * Cp * L),
            transcendentals=int(B * Cp),
            bytes_accessed=int(B * Cp * L * itemsize)),
    )(feat)

    # ---- Pass 2: gather partner stats via scalar-prefetched perm, apply. --
    out = pl.pallas_call(
        _apply_kernel,
        out_shape=jax.ShapeDtypeStruct((B, Cp, L), feat.dtype),
        grid_spec=pltpu.PrefetchScalarGridSpec(
            num_scalar_prefetch=1,             # perm -> SMEM, seen by index_maps
            grid=(B, nc2),
            in_specs=[
                pl.BlockSpec(memory_space=pltpu.MemorySpace.SMEM),        # lam
                pl.BlockSpec((1, tc2, L), lambda b, c, perm: (b, c, 0)),  # x
                pl.BlockSpec((1, tc2, 1), lambda b, c, perm: (b, c, 0)),  # mu
                pl.BlockSpec((1, tc2, 1), lambda b, c, perm: (b, c, 0)),  # sg
                pl.BlockSpec((1, tc2, 1), lambda b, c, perm: (perm[b], c, 0)),
                pl.BlockSpec((1, tc2, 1), lambda b, c, perm: (perm[b], c, 0)),
            ],
            out_specs=pl.BlockSpec((1, tc2, L), lambda b, c, perm: (b, c, 0)),
        ),
        compiler_params=parallel2,
        cost_estimate=pl.CostEstimate(
            flops=int(2 * B * Cp * L),
            transcendentals=0,
            bytes_accessed=int(2 * B * Cp * L * itemsize)),
    )(perm, lam, feat, mu, sigma, mu, sigma)
    return out


# --------------------------------------------------------------------------
# Dispatch wrapper (the 'apply' branch of MixStyle.forward)
# --------------------------------------------------------------------------

def mixstyle_apply(x, perm, lam, *, force_two_pass=False):
    """Runs the MixStyle transform (the 'apply' branch) on NCHW input x."""
    B, C, H, W = x.shape
    L = H * W
    feat = x.reshape(B, C, L)

    cap = _vmem_capacity_bytes()
    vmem_limit = (cap * 3) // 4          # ~96 MiB on v5e/v6e, ~48 MiB on v7x
    # Per-step VMEM ~ in + out blocks (double-buffered) + f32 temps ≈ 6-8
    # block-equivalents; budget blocks at 1/8 of the scoped limit.
    block_budget = vmem_limit // 8

    tc_fused = None if force_two_pass else _choose_c_tile(C, B * L * 4,
                                                          block_budget)
    if tc_fused is not None:
        # ---- fused single-pass path (x read once, written once) ----------
        Cp = ((C + tc_fused - 1) // tc_fused) * tc_fused
        out = _mixstyle_fused(_maybe_pad_c(feat, Cp), perm, lam, tc_fused,
                              vmem_limit)
    else:
        # ---- two-pass fallback: full-batch block does not fit VMEM -------
        tc2 = _choose_c_tile(C, L * 4, block_budget)
        if tc2 is None:
            # TODO(synk): tile L with partial-sum stats for extreme H*W.
            tc2 = min(C, 8)
        Cp = ((C + tc2 - 1) // tc2) * tc2
        nc2 = Cp // tc2
        # Pass 1 has only one large stream -> it can afford a 2x wider tile.
        tc1 = 2 * tc2 if (nc2 % 2 == 0 and 2 * tc2 * L * 4 <= 2 * block_budget) \
            else tc2
        out = _mixstyle_two_pass(_maybe_pad_c(feat, Cp), perm, lam, tc1, tc2,
                                 vmem_limit)

    if Cp != C:
        out = out[:, :C, :]
    return out.reshape(B, C, H, W)


def mixstyle_forward(x, key, p=0.5, alpha=0.1, training=True):
    """Full MixStyle.forward semantics (randomness sampled in JAX)."""
    if not training:
        return x
    k_gate, k_perm, k_lam = jax.random.split(key, 3)
    B = x.shape[0]
    perm = jax.random.permutation(k_perm, B).astype(jnp.int32)
    lam = jax.random.beta(k_lam, alpha, alpha, shape=(B,)).astype(jnp.float32)
    # torch: `if torch.rand(1) > p: return x`  ->  apply iff u <= p.
    apply = jax.random.uniform(k_gate) <= p
    # lax.cond skips the kernels (and their HBM traffic) when not applied.
    return jax.lax.cond(
        apply,
        lambda xx: mixstyle_apply(xx, perm, lam),
        lambda xx: xx,
        x)


# --------------------------------------------------------------------------
# Pure-JAX reference + self-test
# --------------------------------------------------------------------------

def _mixstyle_ref(x, perm, lam):
    """Pure-JAX reference of the 'apply' branch for correctness checking."""
    B, C, H, W = x.shape
    feat = x.reshape(B, C, H * W).astype(jnp.float32)
    mu = feat.mean(axis=2, keepdims=True)
    sigma = feat.std(axis=2, keepdims=True, ddof=1) + 1e-6
    mu2, sigma2 = mu[perm], sigma[perm]
    lam_b = lam[:, None, None]
    mu_mix = mu * lam_b + mu2 * (1.0 - lam_b)
    sigma_mix = sigma * lam_b + sigma2 * (1.0 - lam_b)
    feat_mix = (feat - mu) / sigma * sigma_mix + mu_mix
    return feat_mix.reshape(B, C, H, W)


if __name__ == "__main__":
    key = jax.random.PRNGKey(0)
    k_x, k_mix = jax.random.split(key)

    B, C, H, W = 2, 4, 16, 16
    x = jax.random.normal(k_x, (B, C, H, W), dtype=jnp.float32)

    # Deterministic randomness for the kernel path (same as the module samples)
    k_gate, k_perm, k_lam = jax.random.split(k_mix, 3)
    perm = jax.random.permutation(k_perm, B).astype(jnp.int32)
    lam = jax.random.beta(k_lam, 0.1, 0.1, shape=(B,)).astype(jnp.float32)

    ref = _mixstyle_ref(x, perm, lam)

    # Primary (fused single-pass) path.
    mixed = jax.block_until_ready(mixstyle_apply(x, perm, lam))
    assert mixed.shape == x.shape and mixed.dtype == x.dtype
    assert jnp.allclose(mixed, ref, atol=1e-4, rtol=1e-4)

    # Two-pass fallback path (used when the full-batch block exceeds VMEM).
    mixed2 = jax.block_until_ready(
        mixstyle_apply(x, perm, lam, force_two_pass=True))
    assert jnp.allclose(mixed2, ref, atol=1e-4, rtol=1e-4)

    # Full forward (probabilistic gate via lax.cond) also runs end-to-end.
    out = jax.block_until_ready(mixstyle_forward(x, k_mix, p=0.5, alpha=0.1))
    assert out.shape == x.shape

    print("KERNEL_OK")
</pallas_src>

<mosaic_0001>
module attributes {stable_mosaic.version = 11 : i64} {
  func.func @_fused_kernel(%arg0: i32, %arg1: memref<2xi32, #tpu.memory_space<smem>>, %arg2: memref<2xf32, #tpu.memory_space<smem>>, %arg3: memref<2x4x256xf32, #tpu.memory_space<vmem>>, %arg4: memref<2x4x256xf32, #tpu.memory_space<vmem>>, %arg5: memref<2x4x1xf32, #tpu.memory_space<vmem>>, %arg6: memref<2x4x1xf32, #tpu.memory_space<vmem>>, %arg7: memref<2x4x1xf32, #tpu.memory_space<vmem>>, %arg8: memref<2x4x1xf32, #tpu.memory_space<vmem>>) attributes {dimension_semantics = [#tpu.dimension_semantics<parallel>], iteration_bounds = array<i64: 1>, scalar_prefetch = 0 : i64, scratch_operands = 4 : i64, tpu.core_type = #tpu.core_type<tc>, window_params = [{transform_indices = @transform_0, window_bounds = array<i64: 2>}, {transform_indices = @transform_1, window_bounds = array<i64: 2>}, {transform_indices = @transform_2, window_bounds = array<i64: 2, 4, 256>}, {transform_indices = @transform_3, window_bounds = array<i64: 2, 4, 256>}]} {
    %c0 = arith.constant 0 : index
    %c0_0 = arith.constant 0 : index
    %c0_1 = arith.constant 0 : index
    %0 = vector.load %arg3[%c0, %c0_0, %c0_1] : memref<2x4x256xf32, #tpu.memory_space<vmem>>, vector<2x4x256xf32>
    %cst = arith.constant dense<0.000000e+00> : vector<2x4xf32>
    %1 = vector.multi_reduction <add>, %0, %cst [2] : vector<2x4x256xf32> to vector<2x4xf32>
    %2 = vector.shape_cast %1 : vector<2x4xf32> to vector<2x4x1xf32>
    %cst_2 = arith.constant 3.906250e-03 : f32
    %3 = vector.broadcast %cst_2 : f32 to vector<2x4x1xf32>
    %4 = arith.mulf %2, %3 : vector<2x4x1xf32>
    %5 = vector.broadcast %4 : vector<2x4x1xf32> to vector<2x4x256xf32>
    %6 = arith.subf %0, %5 : vector<2x4x256xf32>
    %7 = arith.mulf %6, %6 : vector<2x4x256xf32>
    %cst_3 = arith.constant dense<0.000000e+00> : vector<2x4xf32>
    %8 = vector.multi_reduction <add>, %7, %cst_3 [2] : vector<2x4x256xf32> to vector<2x4xf32>
    %9 = vector.shape_cast %8 : vector<2x4xf32> to vector<2x4x1xf32>
    %cst_4 = arith.constant 0.00392156886 : f32
    %10 = vector.broadcast %cst_4 : f32 to vector<2x4x1xf32>
    %11 = arith.mulf %9, %10 : vector<2x4x1xf32>
    %c0_5 = arith.constant 0 : index
    %c0_6 = arith.constant 0 : index
    %c0_7 = arith.constant 0 : index
    %12 = vector.load %arg5[%c0_5, %c0_6, %c0_7] : memref<2x4x1xf32, #tpu.memory_space<vmem>>, vector<2x4x1xf32>
    tpu.vector_store %arg5[%c0_5, %c0_6, %c0_7], %4 {strides = array<i32>} : memref<2x4x1xf32, #tpu.memory_space<vmem>>, vector<2x4x1xf32>,
    %13 = math.sqrt %11 : vector<2x4x1xf32>
    %cst_8 = arith.constant 9.99999997E-7 : f32
    %14 = vector.broadcast %cst_8 : f32 to vector<2x4x1xf32>
    %15 = arith.addf %13, %14 : vector<2x4x1xf32>
    %c0_9 = arith.constant 0 : index
    %c0_10 = arith.constant 0 : index
    %c0_11 = arith.constant 0 : index
    %16 = vector.load %arg6[%c0_9, %c0_10, %c0_11] : memref<2x4x1xf32, #tpu.memory_space<vmem>>, vector<2x4x1xf32>
    tpu.vector_store %arg6[%c0_9, %c0_10, %c0_11], %15 {strides = array<i32>} : memref<2x4x1xf32, #tpu.memory_space<vmem>>, vector<2x4x1xf32>,
    %c0_12 = arith.constant 0 : index
    %17 = memref.load %arg1[%c0_12] : memref<2xi32, #tpu.memory_space<smem>>
    %c0_13 = arith.constant 0 : index
    %18 = memref.load %arg2[%c0_13] : memref<2xf32, #tpu.memory_space<smem>>
    %c0_14 = arith.constant 0 : index
    %c0_15 = arith.constant 0 : index
    %c0_16 = arith.constant 0 : index
    %19 = vector.load %arg5[%c0_14, %c0_15, %c0_16] : memref<2x4x1xf32, #tpu.memory_space<vmem>>, vector<1x4x1xf32>
    %20 = vector.shape_cast %19 : vector<1x4x1xf32> to vector<4x1xf32>
    %c0_17 = arith.constant 0 : index
    %c0_18 = arith.constant 0 : index
    %c0_19 = arith.constant 0 : index
    %21 = vector.load %arg6[%c0_17, %c0_18, %c0_19] : memref<2x4x1xf32, #tpu.memory_space<vmem>>, vector<1x4x1xf32>
    %22 = vector.shape_cast %21 : vector<1x4x1xf32> to vector<4x1xf32>
    %23 = arith.index_cast %17 : i32 to index
    %c0_20 = arith.constant 0 : index
    %c0_21 = arith.constant 0 : index
    %24 = vector.load %arg5[%23, %c0_20, %c0_21] : memref<2x4x1xf32, #tpu.memory_space<vmem>>, vector<1x4x1xf32>
    %25 = vector.shape_cast %24 : vector<1x4x1xf32> to vector<4x1xf32>
    %26 = arith.index_cast %17 : i32 to index
    %c0_22 = arith.constant 0 : index
    %c0_23 = arith.constant 0 : index
    %27 = vector.load %arg6[%26, %c0_22, %c0_23] : memref<2x4x1xf32, #tpu.memory_space<vmem>>, vector<1x4x1xf32>
    %28 = vector.shape_cast %27 : vector<1x4x1xf32> to vector<4x1xf32>
    %29 = vector.broadcast %18 : f32 to vector<4x1xf32>
    %30 = arith.mulf %29, %22 : vector<4x1xf32>
    %cst_24 = arith.constant 1.000000e+00 : f32
    %31 = arith.subf %cst_24, %18 : f32
    %32 = vector.broadcast %31 : f32 to vector<4x1xf32>
    %33 = arith.mulf %32, %28 : vector<4x1xf32>
    %34 = arith.addf %30, %33 : vector<4x1xf32>
    %35 = vector.broadcast %18 : f32 to vector<4x1xf32>
    %36 = arith.mulf %35, %20 : vector<4x1xf32>
    %cst_25 = arith.constant 1.000000e+00 : f32
    %37 = arith.subf %cst_25, %18 : f32
    %38 = vector.broadcast %37 : f32 to vector<4x1xf32>
    %39 = arith.mulf %38, %25 : vector<4x1xf32>
    %40 = arith.addf %36, %39 : vector<4x1xf32>
    %41 = arith.divf %34, %22 : vector<4x1xf32>
    %c0_26 = arith.constant 0 : index
    %c0_27 = arith.constant 0 : index
    %c0_28 = arith.constant 0 : index
    %42 = vector.load %arg7[%c0_26, %c0_27, %c0_28] : memref<2x4x1xf32, #tpu.memory_space<vmem>>, vector<1x4x1xf32>
    %43 = vector.shape_cast %42 : vector<1x4x1xf32> to vector<4x1xf32>
    %44 = vector.shape_cast %41 : vector<4x1xf32> to vector<1x4x1xf32>
    tpu.vector_store %arg7[%c0_26, %c0_27, %c0_28], %44 {strides = array<i32>} : memref<2x4x1xf32, #tpu.memory_space<vmem>>, vector<1x4x1xf32>,
    %45 = arith.mulf %20, %41 : vector<4x1xf32>
    %46 = arith.subf %40, %45 : vector<4x1xf32>
    %c0_29 = arith.constant 0 : index
    %c0_30 = arith.constant 0 : index
    %c0_31 = arith.constant 0 : index
    %47 = vector.load %arg8[%c0_29, %c0_30, %c0_31] : memref<2x4x1xf32, #tpu.memory_space<vmem>>, vector<1x4x1xf32>
    %48 = vector.shape_cast %47 : vector<1x4x1xf32> to vector<4x1xf32>
    %49 = vector.shape_cast %46 : vector<4x1xf32> to vector<1x4x1xf32>
    tpu.vector_store %arg8[%c0_29, %c0_30, %c0_31], %49 {strides = array<i32>} : memref<2x4x1xf32, #tpu.memory_space<vmem>>, vector<1x4x1xf32>,
    %c1 = arith.constant 1 : index
    %50 = memref.load %arg1[%c1] : memref<2xi32, #tpu.memory_space<smem>>
    %c1_32 = arith.constant 1 : index
    %51 = memref.load %arg2[%c1_32] : memref<2xf32, #tpu.memory_space<smem>>
    %c1_33 = arith.constant 1 : index
    %c0_34 = arith.constant 0 : index
    %c0_35 = arith.constant 0 : index
    %52 = vector.load %arg5[%c1_33, %c0_34, %c0_35] : memref<2x4x1xf32, #tpu.memory_space<vmem>>, vector<1x4x1xf32>
    %53 = vector.shape_cast %52 : vector<1x4x1xf32> to vector<4x1xf32>
    %c1_36 = arith.constant 1 : index
    %c0_37 = arith.constant 0 : index
    %c0_38 = arith.constant 0 : index
    %54 = vector.load %arg6[%c1_36, %c0_37, %c0_38] : memref<2x4x1xf32, #tpu.memory_space<vmem>>, vector<1x4x1xf32>
    %55 = vector.shape_cast %54 : vector<1x4x1xf32> to vector<4x1xf32>
    %56 = arith.index_cast %50 : i32 to index
    %c0_39 = arith.constant 0 : index
    %c0_40 = arith.constant 0 : index
    %57 = vector.load %arg5[%56, %c0_39, %c0_40] : memref<2x4x1xf32, #tpu.memory_space<vmem>>, vector<1x4x1xf32>
    %58 = vector.shape_cast %57 : vector<1x4x1xf32> to vector<4x1xf32>
    %59 = arith.index_cast %50 : i32 to index
    %c0_41 = arith.constant 0 : index
    %c0_42 = arith.constant 0 : index
    %60 = vector.load %arg6[%59, %c0_41, %c0_42] : memref<2x4x1xf32, #tpu.memory_space<vmem>>, vector<1x4x1xf32>
    %61 = vector.shape_cast %60 : vector<1x4x1xf32> to vector<4x1xf32>
    %62 = vector.broadcast %51 : f32 to vector<4x1xf32>
    %63 = arith.mulf %62, %55 : vector<4x1xf32>
    %cst_43 = arith.constant 1.000000e+00 : f32
    %64 = arith.subf %cst_43, %51 : f32
    %65 = vector.broadcast %64 : f32 to vector<4x1xf32>
    %66 = arith.mulf %65, %61 : vector<4x1xf32>
    %67 = arith.addf %63, %66 : vector<4x1xf32>
    %68 = vector.broadcast %51 : f32 to vector<4x1xf32>
    %69 = arith.mulf %68, %53 : vector<4x1xf32>
    %cst_44 = arith.constant 1.000000e+00 : f32
    %70 = arith.subf %cst_44, %51 : f32
    %71 = vector.broadcast %70 : f32 to vector<4x1xf32>
    %72 = arith.mulf %71, %58 : vector<4x1xf32>
    %73 = arith.addf %69, %72 : vector<4x1xf32>
    %74 = arith.divf %67, %55 : vector<4x1xf32>
    %c1_45 = arith.constant 1 : index
    %c0_46 = arith.constant 0 : index
    %c0_47 = arith.constant 0 : index
    %75 = vector.load %arg7[%c1_45, %c0_46, %c0_47] : memref<2x4x1xf32, #tpu.memory_space<vmem>>, vector<1x4x1xf32>
    %76 = vector.shape_cast %75 : vector<1x4x1xf32> to vector<4x1xf32>
    %77 = vector.shape_cast %74 : vector<4x1xf32> to vector<1x4x1xf32>
    tpu.vector_store %arg7[%c1_45, %c0_46, %c0_47], %77 {strides = array<i32>} : memref<2x4x1xf32, #tpu.memory_space<vmem>>, vector<1x4x1xf32>,
    %78 = arith.mulf %53, %74 : vector<4x1xf32>
    %79 = arith.subf %73, %78 : vector<4x1xf32>
    %c1_48 = arith.constant 1 : index
    %c0_49 = arith.constant 0 : index
    %c0_50 = arith.constant 0 : index
    %80 = vector.load %arg8[%c1_48, %c0_49, %c0_50] : memref<2x4x1xf32, #tpu.memory_space<vmem>>, vector<1x4x1xf32>
    %81 = vector.shape_cast %80 : vector<1x4x1xf32> to vector<4x1xf32>
    %82 = vector.shape_cast %79 : vector<4x1xf32> to vector<1x4x1xf32>
    tpu.vector_store %arg8[%c1_48, %c0_49, %c0_50], %82 {strides = array<i32>} : memref<2x4x1xf32, #tpu.memory_space<vmem>>, vector<1x4x1xf32>,
    %c0_51 = arith.constant 0 : index
    %c0_52 = arith.constant 0 : index
    %c0_53 = arith.constant 0 : index
    %83 = vector.load %arg3[%c0_51, %c0_52, %c0_53] : memref<2x4x256xf32, #tpu.memory_space<vmem>>, vector<2x4x256xf32>
    %c0_54 = arith.constant 0 : index
    %c0_55 = arith.constant 0 : index
    %c0_56 = arith.constant 0 : index
    %84 = vector.load %arg7[%c0_54, %c0_55, %c0_56] : memref<2x4x1xf32, #tpu.memory_space<vmem>>, vector<2x4x1xf32>
    %85 = vector.broadcast %84 : vector<2x4x1xf32> to vector<2x4x256xf32>
    %86 = arith.mulf %83, %85 : vector<2x4x256xf32>
    %c0_57 = arith.constant 0 : index
    %c0_58 = arith.constant 0 : index
    %c0_59 = arith.constant 0 : index
    %87 = vector.load %arg8[%c0_57, %c0_58, %c0_59] : memref<2x4x1xf32, #tpu.memory_space<vmem>>, vector<2x4x1xf32>
    %88 = vector.broadcast %87 : vector<2x4x1xf32> to vector<2x4x256xf32>
    %89 = arith.addf %86, %88 : vector<2x4x256xf32>
    %c0_60 = arith.constant 0 : index
    %c0_61 = arith.constant 0 : index
    %c0_62 = arith.constant 0 : index
    %90 = vector.load %arg4[%c0_60, %c0_61, %c0_62] : memref<2x4x256xf32, #tpu.memory_space<vmem>>, vector<2x4x256xf32>
    tpu.vector_store %arg4[%c0_60, %c0_61, %c0_62], %89 {strides = array<i32>} : memref<2x4x256xf32, #tpu.memory_space<vmem>>, vector<2x4x256xf32>,
    return
  }
  func.func @transform_0(%arg0: i32) -> i32 {
    %c0_i32 = arith.constant 0 : i32
    %c0_i32_0 = arith.constant 0 : i32
    return %c0_i32 : i32
  }
  func.func @transform_1(%arg0: i32) -> i32 {
    %c0_i32 = arith.constant 0 : i32
    %c0_i32_0 = arith.constant 0 : i32
    return %c0_i32 : i32
  }
  func.func @transform_2(%arg0: i32) -> (i32, i32, i32) {
    %c0_i32 = arith.constant 0 : i32
    %c0_i32_0 = arith.constant 0 : i32
    %c0_i32_1 = arith.constant 0 : i32
    return %c0_i32, %arg0, %c0_i32_0 : i32, i32, i32
  }
  func.func @transform_3(%arg0: i32) -> (i32, i32, i32) {
    %c0_i32 = arith.constant 0 : i32
    %c0_i32_0 = arith.constant 0 : i32
    %c0_i32_1 = arith.constant 0 : i32
    return %c0_i32, %arg0, %c0_i32_0 : i32, i32, i32
  }
}

</mosaic_0001>

<bundles_post_ra>
// kernel: tpu_custom_call.1
= control target key start
LH: loop header
LB: loop body
LE: loop exit
PB: predicated region body
PF: predicated region fallthrough
CT: control target
= control target key end

     0   :  { %8 = vsyncpa [#allocation9], 0  ;;  %s493_s0 = inlined_call_operand.hbm [shape: s32[2], index: 0, kind: input, shape index: {}]   ;;  %s494_s1 = inlined_call_operand.vmem [shape: f32[2], index: 1, kind: input, shape index: {}]   ;;  %s495_s2 = inlined_call_operand.hbm [shape: f32[2,4,256], index: 2, kind: input, shape index: {}]   ;;  %s496_s3 = inlined_call_operand.hbm [shape: f32[2,4,256], index: 3, kind: output, shape index: {}]  }
   0x1   :  { %9 = vsyncpa [#allocation10], 0 }
   0x2   :  { %10 = vsyncpa [#allocation7], 0 }
   0x3   :  { %11 = vsyncpa [#allocation8], 0  ;;  %s26_s14 = sshll.u32 %s494_s1, 4  ;;  %s297_s17 = scalar_lea.hbm %s493_s0, 16  ;;  %s27_s14 = int_to_ptr.vmem [resolvable:$true] %s26_s14 }
   0x4   :  { %p298_p0 = scmp.ne.s32.totalorder %s493_s0, %s297_s17  ;;  %p301_p1 = scmp.lt.u32.totalorder %s297_s17, %s493_s0 }
   0x6   :  { %p303_p2 = pnand %p301_p1, %p298_p0 }
   0x8   :  { %306 = shalt.err (!%p303_p2)
}
   0x9   :  { %s371_s22 = smov [#allocation6]   ;;  %s307_s1 = scalar_lea.vmem %s27_s14, 16 }
   0xa   :  { %19 = dma.hbm_to_smem %s493_s0, 16, %s371_s22, [#allocation9]  }
   0xb   :  { %p308_p3 = scmp.ne.s32.totalorder %s27_s14, %s307_s1  ;;  %p312_p4 = scmp.lt.s32.totalorder %s27_s14, %s27_s14 }
   0xc   :  { %p313_p5 = scmp.lt.s32.totalorder %s307_s1, %s307_s1 }
   0xe   :  { %p314_p6 = por %p313_p5, %p312_p4 }
  0x10   :  { %p315_p7 = pnand %p314_p6, %p308_p3 }
  0x12   :  { %318 = shalt.err (!%p315_p7)
}
  0x13   :  { %s372_s25 = smov [#allocation11]   ;;  %s373_s26 = smov [#allocation12]  }
  0x14   :  { %29 = dma.vmem_to_smem %s27_s14, 16, %s372_s25, [#allocation10]  }
  0x15   :  { %s35_s27 = sshll.u32 %s373_s26, 4  ;;  %s319_s30 = scalar_lea.hbm %s495_s2, 256  ;;  %s36_s27 = int_to_ptr.vmem [resolvable:$true] %s35_s27 }
  0x16   :  { %p320_p8 = scmp.ne.s32.totalorder %s495_s2, %s319_s30  ;;  %p323_p9 = scmp.lt.u32.totalorder %s319_s30, %s495_s2 }
  0x18   :  { %p325_p10 = pnand %p323_p9, %p320_p8 }
  0x1a   :  { %328 = shalt.err (!%p325_p10)
}
  0x1b   :  { %s329_s7 = scalar_lea.vmem %s36_s27, 256  ;;  %p334_p12 = scmp.lt.s32.totalorder %s36_s27, %s36_s27 }
  0x1c   :  { %p330_p11 = scmp.ne.s32.totalorder %s36_s27, %s329_s7  ;;  %p335_p13 = scmp.lt.s32.totalorder %s329_s7, %s329_s7 }
  0x1e   :  { %p336_p0 = por %p335_p13, %p334_p12 }
  0x20   :  { %p337_p1 = pnand %p336_p0, %p330_p11 }
  0x22   :  { %340 = shalt.err (!%p337_p1)
}
  0x23   :  { %s374_s8 = smov 128   ;;  %s375_s9 = smov 8  }
  0x24   :  { %41 = dma.hbm_to_vmem [thread:$0]  %s495_s2, 256, %s36_s27, [#allocation7], %s374_s8, %s374_s8, %s375_s9  }
  0x25   :  { %363 = dma.done.wait [#allocation9], 16  }
  0x26   :  { %364 = vsyncadd [#allocation9], 4294967280 }
  0x27   :  { %365 = dma.done.wait [#allocation10], 16  }
  0x28   :  { %366 = vsyncadd [#allocation10], 4294967280 }
  0x29   :  { %367 = dma.done.wait [#allocation7], 256  }
  0x2a   :  { %368 = vsyncadd [#allocation7], 4294967040 }
  0x2b   :  { %51 = sfence }
  0x2c   :  { %v429_v0 = vld [vmem:[#allocation12] sm:$0xff]  ;;  %vm60_vm0 = vcmask 1043456   ;;  %v431_v1 = vld [vmem:[#allocation12 + $0x8] sm:$0xff]  ;;  %v376_v10 = vmov 839922192   ;;  %v78_v12 = vlaneseq  ;;  %vm113_vm1 = vcmask 3072  }
  0x2d   :  { %v56_v2 = vcombine.high %v429_v0, %v429_v0  ;;  %v61_v3 = vsel %vm60_vm0, %v429_v0, 0.0  ;;  %v57_v4 = vcombine.high %v431_v1, %v431_v1  ;;  %v66_v6 = vsel %vm60_vm0, %v431_v1, 0.0  ;;  %s134_s2 = sld [smem:[#allocation6]]  ;;  %s458_s13 = sld [smem:[#allocation6 + $0x1]] }
  0x2e   :  { %v76_v11 = vunpack.c.l.s4 %v376_v10  ;;  %v79_v14 = vshrl.u32 %v78_v12, 7  ;;  %v377_v34 = vmov 0   ;;  %s456_s12 = sld [smem:[#allocation11]]  ;;  %s460_s14 = sld [smem:[#allocation11 + $0x1]] }
  0x2f   :  { %v62_v5 = vsel %vm60_vm0, %v56_v2, 0.0  ;;  %v67_v7 = vsel %vm60_vm0, %v57_v4, 0.0  ;;  %285 = vset.pattern.permute.xlu0 %v377_v34  ;;  %286 = vset.pattern.permute.xlu1 %v377_v34  ;;  %s378_s23 = smov [#allocation13]  }
  0x30   :  { %v63_v8 = vadd.f32 %v62_v5, %v61_v3  ;;  %v68_v9 = vadd.f32 %v67_v7, %v66_v6  ;;  %v77_v13 = vunpack.c.0.s8 %v76_v11  ;;  %s251_s24 = sshll.u32 %s378_s23, 4  ;;  %s252_s24 = int_to_ptr.vmem [resolvable:$true] %s251_s24 }
  0x31   :  { %s341_s1 = scalar_lea.vmem %s252_s24, 256  ;;  %p346_p3 = scmp.lt.s32.totalorder %s252_s24, %s252_s24 }
  0x32   :  { %64 = vadd.xlane.f32.xlu0 %v63_v8  ;;  %v443_v15 = vsub.s32 %v77_v13, %v79_v14  ;;  %p342_p2 = scmp.ne.s32.totalorder %s252_s24, %s341_s1  ;;  %p347_p4 = scmp.lt.s32.totalorder %s341_s1, %s341_s1 }
  0x33   :  { %s273_s15 = sshll.u32 %s134_s2, 2  ;;  %s276_s17 = sshll.u32 %s458_s13, 2 }
  0x34   :  { %s145_s16 = ssub.f32 1.0, %s456_s12  ;;  %s141_s18 = scalar_lea.vmem [#allocation3], %s273_s15  ;;  %v143_v56 = vstv %s456_s12  ;;  %v169_v61 = vstv %s460_s14 }
  0x35   :  { %s171_s19 = ssub.f32 1.0, %s460_s14  ;;  %s139_s20 = scalar_lea.vmem [#allocation2], %s273_s15 }
  0x36   :  { %69 = vadd.xlane.f32.xlu0 %v68_v9  ;;  %v146_v54 = vstv %s145_s16  ;;  %s167_s21 = scalar_lea.vmem [#allocation3], %s276_s17  ;;  %s165_s22 = scalar_lea.vmem [#allocation2], %s276_s17 }
  0x37   :  { %v172_v62 = vstv %s171_s19  ;;  %p348_p5 = por %p347_p4, %p346_p3 }
  0x39   :  { %p349_p6 = pnand %p348_p5, %p342_p2 }
  0xbf   :  { %v65_v16 = vpop.xlane.xlu0 %64 }
  0xc0   :  { %v71_v17 = vmul.f32 0.00390625, %v65_v16 }
  0xc2   :  { %v81_v18 = vrot.slane %v71_v17, %v443_v15  ;;  %114 = vst.msk [vmem:[#allocation2] sm:$0xf] %vm113_vm1, %v71_v17 }
  0xc3   :  { %v70_v19 = vpop.xlane.xlu0 %69 }
  0xc4   :  { %v72_v20 = vmul.f32 0.00390625, %v70_v19  ;;  %v91_v21 = vsub.f32 %v429_v0, %v81_v18 }
  0xc6   :  { %v88_v22 = vrot.slane %v72_v20, %v443_v15  ;;  %115 = vst.msk [vmem:[#allocation2 + $0x4] sm:$0xf] %vm113_vm1, %v72_v20  ;;  %v93_v23 = vmul.f32 %v91_v21, %v91_v21 }
  0xc8   :  { %v92_v24 = vsub.f32 %v431_v1, %v88_v22  ;;  %v97_v25 = vcombine.high %v93_v23, %v93_v23  ;;  %v101_v26 = vsel %vm60_vm0, %v93_v23, 0.0 }
  0xc9   :  { %v136_v60 = vld [vmem:[#allocation2] sm:$0xf] }
  0xca   :  { %v102_v27 = vsel %vm60_vm0, %v97_v25, 0.0  ;;  %v94_v28 = vmul.f32 %v92_v24, %v92_v24  ;;  %v149_v8 = vmul.f32 %v143_v56, %v136_v60 }
  0xcb   :  { %v103_v29 = vadd.f32 %v102_v27, %v101_v26 }
  0xcc   :  { %v98_v30 = vcombine.high %v94_v28, %v94_v28  ;;  %v106_v31 = vsel %vm60_vm0, %v94_v28, 0.0 }
  0xcd   :  { %104 = vadd.xlane.f32.xlu1 %v103_v29  ;;  %v140_v57 = vld [vmem:[%s139_s20] sm:$0xf]  ;;  %v161_v2 = vld [vmem:[#allocation2 + $0x4] sm:$0xf] }
  0xce   :  { %v107_v32 = vsel %vm60_vm0, %v98_v30, 0.0  ;;  %v150_v63 = vmul.f32 %v146_v54, %v140_v57  ;;  %v166_v7 = vld [vmem:[%s165_s22] sm:$0xf]  ;;  %v175_v10 = vmul.f32 %v169_v61, %v161_v2 }
  0xcf   :  { %v108_v33 = vadd.f32 %v107_v32, %v106_v31  ;;  %v176_v12 = vmul.f32 %v172_v62, %v166_v7 }
  0xd0   :  { %v151_v11 = vadd.f32 %v150_v63, %v149_v8 }
  0xd1   :  { %109 = vadd.xlane.f32.xlu1 %v108_v33  ;;  %v177_v19 = vadd.f32 %v176_v12, %v175_v10 }
 0x15a   :  { %v105_v35 = vpop.xlane.xlu1 %104 }
 0x15b   :  { %v111_v36 = vmul.f32 0.003921569, %v105_v35 }
 0x15d   :  { %289 = vrsqrt.f32 %v111_v36  ;;  %vm118_vm2 = vcmp.eq.f32.partialorder %v111_v36, inf  ;;  %v121_v41 = vand.u32 2147483648, %v111_v36  ;;  %vm120_vm3 = vcmp.eq.f32.partialorder %v111_v36, 0.0 }
 0x15e   :  { %v110_v37 = vpop.xlane.xlu1 %109 }
 0x15f   :  { %v112_v38 = vmul.f32 0.003921569, %v110_v37 }
 0x161   :  { %291 = vrsqrt.f32 %v112_v38  ;;  %vm125_vm4 = vcmp.eq.f32.partialorder %v112_v38, inf  ;;  %v128_v47 = vand.u32 2147483648, %v112_v38  ;;  %vm127_vm5 = vcmp.eq.f32.partialorder %v112_v38, 0.0 }
 0x167   :  { %v290_v39 = vpop.eup %289 }
 0x168   :  { %v117_v40 = vmul.f32 %v290_v39, %v111_v36 }
 0x16a   :  { %v119_v42 = vsel %vm118_vm2, %v111_v36, %v117_v40 }
 0x16b   :  { %v292_v43 = vpop.eup %291  ;;  %v122_v44 = vsel %vm120_vm3, %v121_v41, %v119_v42 }
 0x16c   :  { %v130_v45 = vadd.f32 1e-06, %v122_v44  ;;  %v124_v46 = vmul.f32 %v292_v43, %v112_v38 }
 0x16e   :  { %132 = vst.msk [vmem:[#allocation3] sm:$0xf] %vm113_vm1, %v130_v45  ;;  %v126_v48 = vsel %vm125_vm4, %v112_v38, %v124_v46 }
 0x16f   :  { %v129_v49 = vsel %vm127_vm5, %v128_v47, %v126_v48 }
 0x170   :  { %v131_v50 = vadd.f32 1e-06, %v129_v49 }
 0x172   :  { %133 = vst.msk [vmem:[#allocation3 + $0x4] sm:$0xf] %vm113_vm1, %v131_v50 }
 0x175   :  { %v137_v51 = vld [vmem:[#allocation3] sm:$0xf] }
 0x176   :  { %293 = vrcp.f32 %v137_v51  ;;  %v144_v59 = vmul.f32 %v143_v56, %v137_v51 }
 0x179   :  { %v142_v52 = vld [vmem:[%s141_s18] sm:$0xf]  ;;  %v163_v53 = vld [vmem:[#allocation3 + $0x4] sm:$0xf] }
 0x17a   :  { %295 = vrcp.f32 %v163_v53  ;;  %v147_v55 = vmul.f32 %v146_v54, %v142_v52  ;;  %v168_v58 = vld [vmem:[%s167_s21] sm:$0xf]  ;;  %v170_v4 = vmul.f32 %v169_v61, %v163_v53 }
 0x17b   :  { %v173_v5 = vmul.f32 %v172_v62, %v168_v58 }
 0x17c   :  { %v148_v3 = vadd.f32 %v147_v55, %v144_v59 }
 0x17d   :  { %v174_v13 = vadd.f32 %v173_v5, %v170_v4 }
 0x180   :  { %v294_v6 = vpop.eup %293 }
 0x181   :  { %v153_v9 = vmul.f32 %v294_v6, %v148_v3 }
 0x183   :  { %154 = vst.msk [vmem:[#allocation4] sm:$0xf] %vm113_vm1, %v153_v9  ;;  %v155_v14 = vmul.f32 %v153_v9, %v136_v60 }
 0x184   :  { %v296_v16 = vpop.eup %295 }
 0x185   :  { %v179_v17 = vmul.f32 %v296_v16, %v174_v13  ;;  %v156_v18 = vsub.f32 %v151_v11, %v155_v14 }
 0x187   :  { %181 = vst.msk [vmem:[#allocation4 + $0x4] sm:$0xf] %vm113_vm1, %v179_v17  ;;  %157 = vst.msk [vmem:[#allocation5] sm:$0xf] %vm113_vm1, %v156_v18  ;;  %v182_v20 = vmul.f32 %v179_v17, %v161_v2 }
 0x189   :  { %v183_v21 = vsub.f32 %v177_v19, %v182_v20 }
 0x18a   :  { %v188_v22 = vld [vmem:[#allocation4] sm:$0xf] }
 0x18b   :  { %192 = vperm.xlu0 %285, %v188_v22   ;;  %185 = vst.msk [vmem:[#allocation5 + $0x4] sm:$0xf] %vm113_vm1, %v183_v21 }
 0x18e   :  { %v189_v23 = vld [vmem:[#allocation4 + $0x4] sm:$0xf]  ;;  %v216_v24 = vld [vmem:[#allocation5] sm:$0xf] }
 0x18f   :  { %196 = vperm.xlu1 %286, %v189_v23  }
 0x192   :  { %v217_v25 = vld [vmem:[#allocation5 + $0x4] sm:$0xf] }
 0x193   :  { %220 = vperm.xlu1 %286, %v216_v24  }
 0x197   :  { %224 = vperm.xlu1 %286, %v217_v25  }
 0x20a   :  { %v193_v26 = vpop.permute.xlu0 %192 }
 0x20b   :  { %v204_v28 = vrot.slane %v193_v26, %v443_v15 }
 0x20d   :  { %v214_v30 = vmul.f32 %v204_v28, %v429_v0 }
 0x20e   :  { %v197_v27 = vpop.permute.xlu1 %196 }
 0x20f   :  { %v211_v31 = vrot.slane %v197_v27, %v443_v15 }
 0x211   :  { %v215_v35 = vmul.f32 %v211_v31, %v431_v1 }
 0x212   :  { %v221_v29 = vpop.permute.xlu1 %220 }
 0x213   :  { %v232_v32 = vrot.slane %v221_v29, %v443_v15 }
 0x215   :  { %v242_v33 = vadd.f32 %v232_v32, %v214_v30 }
 0x216   :  { %v225_v34 = vpop.permute.xlu1 %224 }
 0x217   :  { %v239_v36 = vrot.slane %v225_v34, %v443_v15  ;;  %244 = vst [vmem:[#allocation13] sm:$0xff] %v242_v33 }
 0x219   :  { %v243_v37 = vadd.f32 %v239_v36, %v215_v35 }
 0x21b   :  { %245 = vst [vmem:[#allocation13 + $0x8] sm:$0xff] %v243_v37 }
 0x21c   :  { %352 = shalt.err (!%p349_p6)
}
 0x21d   :  { %s353_s27 = scalar_lea.hbm %s496_s3, 256 }
 0x21e   :  { %p354_p7 = scmp.ne.s32.totalorder %s496_s3, %s353_s27  ;;  %p357_p8 = scmp.lt.u32.totalorder %s353_s27, %s496_s3 }
 0x220   :  { %p359_p9 = pnand %p357_p8, %p354_p7 }
 0x222   :  { %362 = shalt.err (!%p359_p9)
}
 0x223   :  { %257 = dma.vmem_to_hbm [thread:$0]  %s252_s24, 256, %s496_s3, [#allocation8], %s374_s8, %s374_s8, %s375_s9  }
 0x224   :  { %369 = dma.done.wait [#allocation8], 256  }
 0x225   :  { %370 = vsyncadd [#allocation8], 4294967040 }
 0x226   :  { %261 = vsyncpa [#allocation7], 1 }
 0x227   :  { %262 = vsyncpa [#allocation8], 1 }
 0x228   :  { %263 = vsyncpa [#allocation9], 1 }
 0x229   :  { %264 = vsyncpa [#allocation10], 1 }

</bundles_post_ra>
